<compile_context>
chip_gen: v7x
topology: tpu7x:2x2x1
jax: 0.10.0
libtpu: 0.0.40
codegen_flags: <defaults>
</compile_context>

<pallas_src>
import jax
import jax.numpy as jnp
from jax.experimental import pallas as pl
from jax.experimental.pallas import tpu as pltpu


# ---------------------------------------------------------------------------
# Fused kernel: per image n
#   y   = LeakyReLU( (scale*W) @ x + shift )        (C_out, H*W)   stays in VMEM
#   out = y @ K^T                                    (C_out, H_out*W_out)
# ---------------------------------------------------------------------------
def upsample_fused_kernel(x_ref, w_ref, shift_ref, kt_ref, o_ref):
    # x_ref:     (C_in,  H*W)
    # w_ref:     (C_out, C_in)        -- BN scale already folded in
    # shift_ref: (C_out, 1)           -- folded BN shift
    # kt_ref:    (H*W,   H_out*W_out) -- (A_h ⊗ A_w)^T, pre-transposed
    # o_ref:     (C_out, H_out*W_out) -- lane-dense output slab
    y = jnp.dot(w_ref[...], x_ref[...], preferred_element_type=jnp.float32)
    y = y + shift_ref[...]                       # (C_out, 1) broadcast
    y = jnp.where(y >= 0, y, 0.1 * y)            # LeakyReLU(0.1)
    out = jnp.dot(y, kt_ref[...], preferred_element_type=jnp.float32)
    o_ref[...] = out.astype(o_ref.dtype)


# ---------------------------------------------------------------------------
# Bilinear interpolation matrix (align_corners=False), matches PyTorch exactly.
# ---------------------------------------------------------------------------
def bilinear_matrix(in_size, out_size):
    scale = in_size / out_size
    dst = jnp.arange(out_size, dtype=jnp.float32)
    src = (dst + 0.5) * scale - 0.5
    src = jnp.maximum(src, 0.0)                  # PyTorch clamps negatives to 0
    i0 = jnp.floor(src).astype(jnp.int32)
    i0 = jnp.minimum(i0, in_size - 1)
    i1 = jnp.minimum(i0 + 1, in_size - 1)
    frac = src - i0.astype(jnp.float32)
    rows = jnp.arange(out_size)
    m = jnp.zeros((out_size, in_size), dtype=jnp.float32)
    m = m.at[rows, i0].add(1.0 - frac)
    m = m.at[rows, i1].add(frac)
    return m


# ---------------------------------------------------------------------------
# Wrapper
# ---------------------------------------------------------------------------
def upsample_forward(x, conv_weight, gamma, beta, running_mean, running_var,
                     target_size, eps=1e-5):
    N, C_in, H, W = x.shape
    C_out = conv_weight.shape[0]
    H_out, W_out = target_size
    HW = H * W
    HWo = H_out * W_out

    # Fold eval-mode BatchNorm into the conv weight (scale) + a per-channel shift.
    scale = gamma / jnp.sqrt(running_var + eps)
    shift = (beta - running_mean * scale).reshape(C_out, 1).astype(jnp.float32)
    w2d = conv_weight.reshape(C_out, C_in).astype(jnp.float32)
    w_scaled = w2d * scale.reshape(C_out, 1)

    # Exact separable bilinear resize as one matmul:  out = y @ (A_h ⊗ A_w)^T.
    ah = bilinear_matrix(H, H_out)               # (H_out, H)
    aw = bilinear_matrix(W, W_out)               # (W_out, W)
    kt = jnp.kron(ah, aw).T                      # (H*W, H_out*W_out), transposed once

    x_flat = x.reshape(N, C_in, HW)              # free view, HW on lanes

    out_flat = pl.pallas_call(
        upsample_fused_kernel,
        out_shape=jax.ShapeDtypeStruct((N, C_out, HWo), jnp.float32),
        grid=(N,),
        in_specs=[
            pl.BlockSpec((None, C_in, HW), lambda n: (n, 0, 0)),   # squeezed lead dim
            pl.BlockSpec((C_out, C_in), lambda n: (0, 0)),
            pl.BlockSpec((C_out, 1), lambda n: (0, 0)),
            pl.BlockSpec((HW, HWo), lambda n: (0, 0)),
        ],
        out_specs=pl.BlockSpec((None, C_out, HWo), lambda n: (n, 0, 0)),
        compiler_params=pltpu.CompilerParams(
            dimension_semantics=("parallel",)),
    )(x_flat, w_scaled, shift, kt)

    return out_flat.reshape(N, C_out, H_out, W_out)


# ---------------------------------------------------------------------------
# Pure-JAX reference (same math, unfused) for a sanity check.
# ---------------------------------------------------------------------------
def upsample_reference(x, conv_weight, gamma, beta, running_mean, running_var,
                       target_size, eps=1e-5):
    N, C_in, H, W = x.shape
    C_out = conv_weight.shape[0]
    H_out, W_out = target_size
    scale = gamma / jnp.sqrt(running_var + eps)
    shift = beta - running_mean * scale
    w2d = conv_weight.reshape(C_out, C_in)
    y = jnp.einsum('oi,nihw->nohw', w2d, x)
    y = y * scale[None, :, None, None] + shift[None, :, None, None]
    y = jnp.where(y >= 0, y, 0.1 * y)
    ah = bilinear_matrix(H, H_out)
    aw = bilinear_matrix(W, W_out)
    return jnp.einsum('ph,nchw,qw->ncpq', ah, y, aw)


if __name__ == "__main__":
    key = jax.random.PRNGKey(0)
    k_x, k_w, k_g, k_b, k_m, k_v = jax.random.split(key, 6)

    N, C_in, C_out, H, W = 2, 4, 8, 16, 16
    target_size = (32, 32)

    x = jax.random.normal(k_x, (N, C_in, H, W), dtype=jnp.float32)
    conv_weight = 0.2 * jax.random.normal(k_w, (C_out, C_in, 1, 1), dtype=jnp.float32)
    gamma = 1.0 + 0.1 * jax.random.normal(k_g, (C_out,), dtype=jnp.float32)
    beta = 0.1 * jax.random.normal(k_b, (C_out,), dtype=jnp.float32)
    running_mean = 0.05 * jax.random.normal(k_m, (C_out,), dtype=jnp.float32)
    running_var = 1.0 + 0.1 * jnp.abs(jax.random.normal(k_v, (C_out,), dtype=jnp.float32))

    out = upsample_forward(x, conv_weight, gamma, beta, running_mean,
                           running_var, target_size)
    jax.block_until_ready(out)
    assert out.shape == (N, C_out, target_size[0], target_size[1])

    ref = upsample_reference(x, conv_weight, gamma, beta, running_mean,
                             running_var, target_size)
    jax.block_until_ready(ref)
    assert jnp.allclose(out, ref, rtol=1e-3, atol=1e-3)

    print("KERNEL_OK")
</pallas_src>

<mosaic_0001>
module attributes {stable_mosaic.version = 11 : i64} {
  func.func @upsample_fused_kernel(%arg0: i32, %arg1: memref<1x4x256xf32, #tpu.memory_space<vmem>>, %arg2: memref<8x4xf32, #tpu.memory_space<vmem>>, %arg3: memref<8x1xf32, #tpu.memory_space<vmem>>, %arg4: memref<256x1024xf32, #tpu.memory_space<vmem>>, %arg5: memref<1x8x1024xf32, #tpu.memory_space<vmem>>) attributes {dimension_semantics = [#tpu.dimension_semantics<parallel>], iteration_bounds = array<i64: 2>, scalar_prefetch = 0 : i64, scratch_operands = 0 : i64, tpu.core_type = #tpu.core_type<tc>, window_params = [{transform_indices = @transform_0, window_bounds = array<i64: 1, 4, 256>}, {pipeline_mode = #tpu.pipeline_mode<synchronous>, transform_indices = @transform_1, window_bounds = array<i64: 8, 4>}, {pipeline_mode = #tpu.pipeline_mode<synchronous>, transform_indices = @transform_2, window_bounds = array<i64: 8, 1>}, {pipeline_mode = #tpu.pipeline_mode<synchronous>, transform_indices = @transform_3, window_bounds = array<i64: 256, 1024>}, {transform_indices = @transform_4, window_bounds = array<i64: 1, 8, 1024>}]} {
    %c0 = arith.constant 0 : index
    %c0_0 = arith.constant 0 : index
    %0 = vector.load %arg2[%c0, %c0_0] : memref<8x4xf32, #tpu.memory_space<vmem>>, vector<8x4xf32>
    %c0_1 = arith.constant 0 : index
    %c0_2 = arith.constant 0 : index
    %c0_3 = arith.constant 0 : index
    %1 = vector.load %arg1[%c0_1, %c0_2, %c0_3] : memref<1x4x256xf32, #tpu.memory_space<vmem>>, vector<1x4x256xf32>
    %2 = vector.shape_cast %1 : vector<1x4x256xf32> to vector<4x256xf32>
    %cst = arith.constant dense<0.000000e+00> : vector<8x256xf32>
    %3 = tpu.matmul %0, %2, %cst {dimension_numbers = #tpu.dot_dimension_numbers<[1], [0], [0], [1], [0, 0, 1, 1], [], []>} : vector<8x4xf32>, vector<4x256xf32>, vector<8x256xf32> -> vector<8x256xf32>
    %c0_4 = arith.constant 0 : index
    %c0_5 = arith.constant 0 : index
    %4 = vector.load %arg3[%c0_4, %c0_5] : memref<8x1xf32, #tpu.memory_space<vmem>>, vector<8x1xf32>
    %5 = vector.broadcast %4 : vector<8x1xf32> to vector<8x256xf32>
    %6 = arith.addf %3, %5 : vector<8x256xf32>
    %cst_6 = arith.constant 0.000000e+00 : f32
    %7 = vector.broadcast %cst_6 : f32 to vector<8x256xf32>
    %8 = arith.cmpf oge, %6, %7 : vector<8x256xf32>
    %cst_7 = arith.constant 1.000000e-01 : f32
    %9 = vector.broadcast %cst_7 : f32 to vector<8x256xf32>
    %10 = arith.mulf %9, %6 : vector<8x256xf32>
    %11 = arith.select %8, %6, %10 : vector<8x256xi1>, vector<8x256xf32>
    %c0_8 = arith.constant 0 : index
    %c0_9 = arith.constant 0 : index
    %12 = vector.load %arg4[%c0_8, %c0_9] : memref<256x1024xf32, #tpu.memory_space<vmem>>, vector<256x1024xf32>
    %cst_10 = arith.constant dense<0.000000e+00> : vector<8x1024xf32>
    %13 = tpu.matmul %11, %12, %cst_10 {dimension_numbers = #tpu.dot_dimension_numbers<[1], [0], [0], [1], [0, 0, 1, 1], [], []>} : vector<8x256xf32>, vector<256x1024xf32>, vector<8x1024xf32> -> vector<8x1024xf32>
    %c0_11 = arith.constant 0 : index
    %c0_12 = arith.constant 0 : index
    %c0_13 = arith.constant 0 : index
    %14 = vector.load %arg5[%c0_11, %c0_12, %c0_13] : memref<1x8x1024xf32, #tpu.memory_space<vmem>>, vector<1x8x1024xf32>
    %15 = vector.shape_cast %14 : vector<1x8x1024xf32> to vector<8x1024xf32>
    %16 = vector.shape_cast %13 : vector<8x1024xf32> to vector<1x8x1024xf32>
    tpu.vector_store %arg5[%c0_11, %c0_12, %c0_13], %16 {strides = array<i32>} : memref<1x8x1024xf32, #tpu.memory_space<vmem>>, vector<1x8x1024xf32>,
    return
  }
  func.func @transform_0(%arg0: i32) -> (i32, i32, i32) {
    %c0_i32 = arith.constant 0 : i32
    %c0_i32_0 = arith.constant 0 : i32
    %c0_i32_1 = arith.constant 0 : i32
    return %arg0, %c0_i32, %c0_i32_0 : i32, i32, i32
  }
  func.func @transform_1(%arg0: i32) -> (i32, i32) {
    %c0_i32 = arith.constant 0 : i32
    %c0_i32_0 = arith.constant 0 : i32
    %c0_i32_1 = arith.constant 0 : i32
    return %c0_i32, %c0_i32_0 : i32, i32
  }
  func.func @transform_2(%arg0: i32) -> (i32, i32) {
    %c0_i32 = arith.constant 0 : i32
    %c0_i32_0 = arith.constant 0 : i32
    %c0_i32_1 = arith.constant 0 : i32
    return %c0_i32, %c0_i32_0 : i32, i32
  }
  func.func @transform_3(%arg0: i32) -> (i32, i32) {
    %c0_i32 = arith.constant 0 : i32
    %c0_i32_0 = arith.constant 0 : i32
    %c0_i32_1 = arith.constant 0 : i32
    return %c0_i32, %c0_i32_0 : i32, i32
  }
  func.func @transform_4(%arg0: i32) -> (i32, i32, i32) {
    %c0_i32 = arith.constant 0 : i32
    %c0_i32_0 = arith.constant 0 : i32
    %c0_i32_1 = arith.constant 0 : i32
    return %arg0, %c0_i32, %c0_i32_0 : i32, i32, i32
  }
}

</mosaic_0001>

<bundles_post_ra>
// kernel: tpu_custom_call.1
= control target key start
LH: loop header
LB: loop body
LE: loop exit
PB: predicated region body
PF: predicated region fallthrough
CT: control target
= control target key end

     0   :  { %9 = vsyncpa [#allocation3], 0  ;;  %s1549_s0 = inlined_call_operand.vmem [shape: f32[2,4,256], index: 0, kind: input, shape index: {}]   ;;  %s1550_s1 = inlined_call_operand.vmem [shape: f32[8,4], index: 1, kind: input, shape index: {}]   ;;  %s1551_s2 = inlined_call_operand.vmem [shape: f32[8,1], index: 2, kind: input, shape index: {}]   ;;  %s1552_s3 = inlined_call_operand.hbm [shape: f32[256,1024], index: 3, kind: input, shape index: {}]   ;;  %s1553_s4 = inlined_call_operand.hbm [shape: f32[2,8,1024], index: 4, kind: output, shape index: {}]  }
   0x1   :  { %10 = vsyncpa [#allocation4], 0 }
   0x2   :  { %12 = vsyncpa [#allocation4 + $0x1], 0  ;;  %s1399_s15 = smov 0   ;;  %s1401_s16 = smov 0  }
   0x3   :  { %s1403_s17 = smov 0   ;;  %s1405_s18 = smov 0  }
   0x4 LB: > { %s1420_s19 = sadd.s32 4294967295, %s1366_s18   ;;  %s941_s20 = sadd.s32 4294967294, %s1366_s18   ;;  %s1366_s18 = sphi %s1405_s18, %s1569_s18   ;;  %s1362_s17 = sphi %s1403_s17, %s1568_s17   ;;  %s1358_s16 = sphi %s1401_s16, %s1567_s16   ;;  %s1354_s15 = sphi %s1399_s15, %s1566_s15  }
   0x5   : > { %s1424_s21 = sadd.s32 1, %s1366_s18   ;;  %s114_s22 = sadd.s32 1, %s1362_s17 }
   0x6   : > { %s111_s23 = ssub.s32 %s1366_s18, %s1424_s21  ;;  %p124_p0 = scmp.ne.s32.totalorder %s1362_s17, %s1358_s16 }
   0x7   : > { %p112_p1 = scmp.eq.s32.totalorder %s111_s23, 0  ;;  %p125_p2 = scmp.eq.s32.totalorder %s1420_s19, 1 }
   0x8   : > { %p130_p3 = scmp.ne.s32.totalorder %s1358_s16, %s1354_s15  ;;  %p131_p4 = scmp.eq.s32.totalorder %s941_s20, 1 }
   0x9   : > { %s1435_s24 = scalar_select %p112_p1, %s1362_s17, %s114_s22  }
   0xa   : > { %p1437_p5 = por %p125_p2, %p124_p0  ;;  %p1441_p6 = por %p131_p4, %p130_p3 }
   0xb   : > { %p942_p7 = scmp.ge.s32.totalorder %s1366_s18, 1  ;;  %p138_p8 = scmp.lt.s32.totalorder %s1366_s18, 3 }
   0xc   : > { %s1557_s25 = scalar_select %p1437_p5, 1, 0 }
   0xd   : > { %s1558_s26 = scalar_select %p1441_p6, 1, 0 }
   0xe   : > { %p1554_p9 = scmp.eq.s32.totalorder %s1420_s19, 0  ;;  %p1448_p10 = pnand %p942_p7, %p138_p8 }
   0xf   : > { %s1368_s28 = smov [#allocation2]   ;;  %s1272_s7 = scalar_lea.hbm %s1552_s3, 32768 }
  0x10   : > { %s1559_s27 = scalar_select %p1448_p10, 1, 0 }
  0x11   : > { %s156_s29 = sshll.u32 %s1368_s28, 4  ;;  %p1222_p11 = pneg %p1448_p10  ;;  %s157_s29 = int_to_ptr.vmem [resolvable:$true] %s156_s29 }
  0x12   : > { %p1273_p13 = scmp.ne.s32.totalorder %s1552_s3, %s1272_s7  ;;  %p1279_p3 = scmp.lt.u32.totalorder %s1272_s7, %s1552_s3 }
  0x13   : > { %p1456_p12 = pnand %p1554_p9, %p1222_p11 }
  0x15   : > { %p1274_p0 = pneg %p1456_p12 }
  0x17   : > { %p1275_p1 = pnand %p1274_p0, %p1273_p13 }
  0x19   : > { %p1276_p2 = pneg %p1275_p1 }
  0x1b   : > { %p1281_p4 = pnand %p1279_p3, %p1276_p2 }
  0x1d   : > { %1284 = shalt.err (!%p1281_p4)
}
  0x1e   : > { %s1285_s12 = scalar_lea.vmem %s157_s29, 32768  ;;  %p1293_p9 = scmp.lt.s32.totalorder %s157_s29, %s157_s29 }
  0x1f   : > { %p1286_p7 = scmp.ne.s32.totalorder %s157_s29, %s1285_s12  ;;  %p1294_p6 = scmp.lt.s32.totalorder %s1285_s12, %s1285_s12 }
  0x21   : > { %p1288_p8 = pnand %p1286_p7, %p1274_p0  ;;  %p1295_p5 = por %p1294_p6, %p1293_p9 }
  0x23   : > { %p1289_p11 = pneg %p1288_p8 }
  0x25   : > { %p1296_p10 = pnand %p1295_p5, %p1289_p11 }
  0x27   : > { %1299 = shalt.err (!%p1296_p10)
}
  0x28   : > { %s1369_s13 = smov 1024   ;;  %s1370_s14 = smov 64  }
  0x29   : > { %1225 = dma.hbm_to_vmem [thread:$0]  (!%p1456_p12), %s1552_s3, 32768, %s157_s29, [#allocation3], %s1369_s13, %s1369_s13, %s1370_s14  }
  0x2a   : > { %p1561_p13 = scmp.ne.s32.totalorder %s1559_s27, 0 }
  0x2b   : > { %p1562_p1 = scmp.eq.s32.totalorder (!%p1561_p13), %s1420_s19, 0 }
  0x2c   : > { %180 = sbr.rel (%p1561_p13) target bundleno = 573 (0x23d), region = 36 }
  0x33   : > { %1345 = dma.done.wait (%p1562_p1), [#allocation3], 32768   ;;  %p1563_p0 = pmov %p1562_p1 }
  0x34   : > { %p206_p5 = scmp.lt.s32.totalorder %s1420_s19, 1  ;;  %v1371_v0 = vmov 0.0   ;;  %v1372_v1 = vmov 0   ;;  %vm225_vm0 = vcmask 1043456   ;;  %v211_v3 = vld [vmem:[%s1550_s1] sm:$0xff]  ;;  %v308_v6 = vld [vmem:[#allocation2 + $0x8] sm:$0xff] }
  0x35   : > { %1347 = vsyncadd (%p1563_p0), [#allocation3], 4294934528  ;;  %294 = vmatprep.mubr.f32.mxu0 %v1371_v0  ;;  %1270 = vset.pattern.permute.xlu0 %v1372_v1  ;;  %v213_v4 = vld [vmem:[%s1551_s2] sm:$0xff]  ;;  %v316_v7 = vld [vmem:[#allocation2 + $0x48] sm:$0xff]  ;;  %vm221_vm1 = vcmask 31744   ;;  %s203_s9 = sand.u32 1, %s1358_s16  }
  0x36   : > { %s207_s23 = scalar_select %p206_p5, %s1420_s19, 1  ;;  %216 = vperm.xlu0 %1270, %v213_v4   ;;  %v310_v8 = vld [vmem:[#allocation2 + $0x18] sm:$0xff]  ;;  %v960_v9 = vpack.c.bf16 %v316_v7, %v308_v6  ;;  %v307_v11 = vld [vmem:[#allocation2] sm:$0xff]  ;;  %v309_v15 = vld [vmem:[#allocation2 + $0x10] sm:$0xff] }
  0x37   : > { %v318_v10 = vld [vmem:[#allocation2 + $0x58] sm:$0xff]  ;;  %v315_v12 = vld [vmem:[#allocation2 + $0x40] sm:$0xff]  ;;  %v317_v16 = vld [vmem:[#allocation2 + $0x50] sm:$0xff]  ;;  %s947_s10 = sshll.u32 %s203_s9, 6  ;;  %s959_s12 = sshll.u32 %s1420_s19, 10 }
  0x38   : > { %s958_s28 = sshll.u32 %s207_s23, 3  ;;  %v1024_v13 = vpack.c.bf16 %v318_v10, %v310_v8  ;;  %v962_v14 = vpack.c.bf16 %v315_v12, %v307_v11  ;;  %v324_v17 = vld [vmem:[#allocation2 + $0x88] sm:$0xff]  ;;  %961 = vmatprep.subr.bf16.mxu1 %v960_v9  ;;  %v1026_v18 = vpack.c.bf16 %v317_v16, %v309_v15  ;;  %v326_v20 = vld [vmem:[#allocation2 + $0x98] sm:$0xff]  ;;  %v323_v24 = vld [vmem:[#allocation2 + $0x80] sm:$0xff]  ;;  %s205_s11 = scalar_lea.vmem [#allocation5], %s947_s10 }
  0x39   : > { %s210_s27 = scalar_lea.vmem %s1549_s0, %s958_s28  ;;  %v332_v19 = vld [vmem:[#allocation2 + $0xc8] sm:$0xff]  ;;  %v334_v21 = vld [vmem:[#allocation2 + $0xd8] sm:$0xff]  ;;  %v331_v25 = vld [vmem:[#allocation2 + $0xc0] sm:$0xff]  ;;  %s870_s13 = sshll.u32 %s205_s11, 4  ;;  %s1509_s13 = int_to_ptr.vmem [resolvable:$true] %s870_s13 }
  0x3a   : > { %v212_v2 = vld [vmem:[%s210_s27] sm:$0xff]  ;;  %v964_v22 = vpack.c.bf16 %v332_v19, %v324_v17  ;;  %v1028_v23 = vpack.c.bf16 %v334_v21, %v326_v20  ;;  %v325_v26 = vld [vmem:[#allocation2 + $0x90] sm:$0xff]  ;;  %963 = vmatpush1.bf16.msra.mxu1 %v962_v14  ;;  %v966_v27 = vpack.c.bf16 %v331_v25, %v323_v24  ;;  %v340_v29 = vld [vmem:[#allocation2 + $0x108] sm:$0xff]  ;;  %s1507_s22 = scalar_lea.hbm %s1553_s4, %s959_s12  ;;  %s856_s19 = scalar_lea.sflag [#allocation4], %s203_s9 }
  0x3b   : > { %v220_v5 = vcombine.high %v212_v2, %v212_v2  ;;  %v333_v28 = vld [vmem:[#allocation2 + $0xd0] sm:$0xff]  ;;  %v348_v30 = vld [vmem:[#allocation2 + $0x148] sm:$0xff]  ;;  %v342_v33 = vld [vmem:[#allocation2 + $0x118] sm:$0xff]  ;;  %s1300_s23 = scalar_lea.vmem %s1509_s13, 1024  ;;  %p1564_p9 = scmp.ne.s32.totalorder %s1557_s25, 0 }
  0x3c   : > { %965 = vmatprep.subr.bf16.mxu1 %v964_v22  ;;  %v1030_v31 = vpack.c.bf16 %v333_v28, %v325_v26  ;;  %v968_v32 = vpack.c.bf16 %v348_v30, %v340_v29  ;;  %v350_v34 = vld [vmem:[#allocation2 + $0x158] sm:$0xff]  ;;  %v339_v35 = vld [vmem:[#allocation2 + $0x100] sm:$0xff]  ;;  %v341_v38 = vld [vmem:[#allocation2 + $0x110] sm:$0xff]  ;;  %p1301_p6 = scmp.ne.s32.totalorder %s1509_s13, %s1300_s23  ;;  %s1373_s28 = smov [#allocation5]  }
  0x3d   : > { %950 = vmatprep.subr.msk.mxu0 %vm225_vm0, %v220_v5  ;;  %v1032_v36 = vpack.c.bf16 %v350_v34, %v342_v33  ;;  %v347_v37 = vld [vmem:[#allocation2 + $0x140] sm:$0xff]  ;;  %v349_v39 = vld [vmem:[#allocation2 + $0x150] sm:$0xff]  ;;  %v356_v40 = vld [vmem:[#allocation2 + $0x188] sm:$0xff]  ;;  %s1304_s30 = sshll.u32 %s1373_s28, 4  ;;  %s1305_s30 = int_to_ptr.vmem [resolvable:$false] %s1304_s30 }
  0x3e   : > { %951 = vmatpush1.msk.msra.mxu0 %vm225_vm0, %v212_v2  ;;  %v364_v41 = vld [vmem:[#allocation2 + $0x1c8] sm:$0xff]  ;;  %v358_v42 = vld [vmem:[#allocation2 + $0x198] sm:$0xff]  ;;  %967 = vmatpush1.bf16.msra.mxu1 %v966_v27  ;;  %v970_v43 = vpack.c.bf16 %v347_v37, %v339_v35  ;;  %v1034_v44 = vpack.c.bf16 %v349_v39, %v341_v38  ;;  %v355_v46 = vld [vmem:[#allocation2 + $0x180] sm:$0xff]  ;;  %p1302_p10 = pnand %p1301_p6, %p1564_p9  ;;  %s1306_s29 = scalar_lea.vmem %s1305_s30, 2048 }
  0x3f   : > { %952 = vmatmul.mubr.msk.f32.vlgmr.msra.gmra.mrb[0].mxu0 %vm221_vm1, %v211_v3  ;;  %1025 = vmatprep.subr.bf16.mxu0 %v1024_v13  ;;  %v366_v45 = vld [vmem:[#allocation2 + $0x1d8] sm:$0xff]  ;;  %v363_v47 = vld [vmem:[#allocation2 + $0x1c0] sm:$0xff]  ;;  %v972_v48 = vpack.c.bf16 %v364_v41, %v356_v40  ;;  %v357_v50 = vld [vmem:[#allocation2 + $0x190] sm:$0xff]  ;;  %p1307_p2 = scmp.lt.s32.totalorder %s1509_s13, %s1305_s30  ;;  %p1308_p3 = scmp.lt.s32.totalorder %s1306_s29, %s1300_s23 }
  0x40   : > { %1027 = vmatpush1.bf16.msra.mxu0 %v1026_v18  ;;  %969 = vmatprep.subr.bf16.mxu1 %v968_v32  ;;  %v1036_v49 = vpack.c.bf16 %v366_v45, %v358_v42  ;;  %v365_v51 = vld [vmem:[#allocation2 + $0x1d0] sm:$0xff]  ;;  %v372_v52 = vld [vmem:[#allocation2 + $0x208] sm:$0xff]  ;;  %v374_v54 = vld [vmem:[#allocation2 + $0x218] sm:$0xff]  ;;  %v974_v56 = vpack.c.bf16 %v363_v47, %v355_v46  ;;  %p1303_p12 = pneg %p1302_p10 }
  0x41   : > { %1029 = vmatprep.subr.bf16.mxu0 %v1028_v23  ;;  %v380_v53 = vld [vmem:[#allocation2 + $0x248] sm:$0xff]  ;;  %v382_v55 = vld [vmem:[#allocation2 + $0x258] sm:$0xff]  ;;  %v1038_v57 = vpack.c.bf16 %v365_v51, %v357_v50  ;;  %v371_v58 = vld [vmem:[#allocation2 + $0x200] sm:$0xff]  ;;  %p1309_p4 = por %p1308_p3, %p1307_p2 }
  0x42   : > { %971 = vmatpush1.bf16.msra.mxu1 %v970_v43  ;;  %v379_v59 = vld [vmem:[#allocation2 + $0x240] sm:$0xff]  ;;  %v976_v60 = vpack.c.bf16 %v380_v53, %v372_v52  ;;  %v1040_v61 = vpack.c.bf16 %v382_v55, %v374_v54  ;;  %v373_v62 = vld [vmem:[#allocation2 + $0x210] sm:$0xff]  ;;  %v388_v0 = vld [vmem:[#allocation2 + $0x288] sm:$0xff] }
  0x43   : > { %973 = vmatprep.subr.bf16.mxu1 %v972_v48  ;;  %v381_v63 = vld [vmem:[#allocation2 + $0x250] sm:$0xff]  ;;  %v396_v1 = vld [vmem:[#allocation2 + $0x2c8] sm:$0xff]  ;;  %v390_v2 = vld [vmem:[#allocation2 + $0x298] sm:$0xff]  ;;  %v978_v4 = vpack.c.bf16 %v379_v59, %v371_v58  ;;  %p1310_p7 = pnand %p1309_p4, %p1303_p12 }
  0x44   : > { %1031 = vmatpush1.bf16.msra.mxu0 %v1030_v31  ;;  %v398_v3 = vld [vmem:[#allocation2 + $0x2d8] sm:$0xff]  ;;  %v1042_v5 = vpack.c.bf16 %v381_v63, %v373_v62  ;;  %v387_v6 = vld [vmem:[#allocation2 + $0x280] sm:$0xff]  ;;  %v980_v8 = vpack.c.bf16 %v396_v1, %v388_v0  ;;  %v389_v10 = vld [vmem:[#allocation2 + $0x290] sm:$0xff] }
  0x45   : > { %1033 = vmatprep.subr.bf16.mxu0 %v1032_v36  ;;  %v395_v7 = vld [vmem:[#allocation2 + $0x2c0] sm:$0xff]  ;;  %v1044_v9 = vpack.c.bf16 %v398_v3, %v390_v2  ;;  %v397_v11 = vld [vmem:[#allocation2 + $0x2d0] sm:$0xff]  ;;  %v404_v12 = vld [vmem:[#allocation2 + $0x308] sm:$0xff] }
  0x46   : > { %975 = vmatpush1.bf16.msra.mxu1 %v974_v56  ;;  %v412_v13 = vld [vmem:[#allocation2 + $0x348] sm:$0xff]  ;;  %v406_v14 = vld [vmem:[#allocation2 + $0x318] sm:$0xff]  ;;  %v982_v16 = vpack.c.bf16 %v395_v7, %v387_v6  ;;  %v1046_v17 = vpack.c.bf16 %v397_v11, %v389_v10  ;;  %v403_v18 = vld [vmem:[#allocation2 + $0x300] sm:$0xff] }
  0x47   : > { %977 = vmatprep.subr.bf16.mxu1 %v976_v60  ;;  %v414_v15 = vld [vmem:[#allocation2 + $0x358] sm:$0xff]  ;;  %v411_v19 = vld [vmem:[#allocation2 + $0x340] sm:$0xff]  ;;  %v984_v20 = vpack.c.bf16 %v412_v13, %v404_v12  ;;  %v405_v22 = vld [vmem:[#allocation2 + $0x310] sm:$0xff] }
  0x48   : > { %1035 = vmatpush1.bf16.msra.mxu0 %v1034_v44  ;;  %v1048_v21 = vpack.c.bf16 %v414_v15, %v406_v14  ;;  %v413_v23 = vld [vmem:[#allocation2 + $0x350] sm:$0xff]  ;;  %v420_v24 = vld [vmem:[#allocation2 + $0x388] sm:$0xff]  ;;  %v422_v26 = vld [vmem:[#allocation2 + $0x398] sm:$0xff]  ;;  %v986_v28 = vpack.c.bf16 %v411_v19, %v403_v18 }
  0x49   : > { %1037 = vmatprep.subr.bf16.mxu0 %v1036_v49  ;;  %v428_v25 = vld [vmem:[#allocation2 + $0x3c8] sm:$0xff]  ;;  %v430_v27 = vld [vmem:[#allocation2 + $0x3d8] sm:$0xff]  ;;  %v1050_v29 = vpack.c.bf16 %v413_v23, %v405_v22  ;;  %v419_v30 = vld [vmem:[#allocation2 + $0x380] sm:$0xff] }
  0x4a   : > { %979 = vmatpush1.bf16.msra.mxu1 %v978_v4  ;;  %v427_v31 = vld [vmem:[#allocation2 + $0x3c0] sm:$0xff]  ;;  %v988_v32 = vpack.c.bf16 %v428_v25, %v420_v24  ;;  %v1052_v33 = vpack.c.bf16 %v430_v27, %v422_v26  ;;  %v421_v34 = vld [vmem:[#allocation2 + $0x390] sm:$0xff]  ;;  %v436_v36 = vld [vmem:[#allocation2 + $0x408] sm:$0xff] }
  0x4b   : > { %981 = vmatprep.subr.bf16.mxu1 %v980_v8  ;;  %v429_v35 = vld [vmem:[#allocation2 + $0x3d0] sm:$0xff]  ;;  %v444_v37 = vld [vmem:[#allocation2 + $0x448] sm:$0xff]  ;;  %v438_v38 = vld [vmem:[#allocation2 + $0x418] sm:$0xff]  ;;  %v990_v40 = vpack.c.bf16 %v427_v31, %v419_v30 }
  0x4c   : > { %1039 = vmatpush1.bf16.msra.mxu0 %v1038_v57  ;;  %v446_v39 = vld [vmem:[#allocation2 + $0x458] sm:$0xff]  ;;  %v1054_v41 = vpack.c.bf16 %v429_v35, %v421_v34  ;;  %v435_v42 = vld [vmem:[#allocation2 + $0x400] sm:$0xff]  ;;  %v992_v44 = vpack.c.bf16 %v444_v37, %v436_v36  ;;  %v437_v46 = vld [vmem:[#allocation2 + $0x410] sm:$0xff] }
  0x4d   : > { %1041 = vmatprep.subr.bf16.mxu0 %v1040_v61  ;;  %v443_v43 = vld [vmem:[#allocation2 + $0x440] sm:$0xff]  ;;  %v1056_v45 = vpack.c.bf16 %v446_v39, %v438_v38  ;;  %v445_v47 = vld [vmem:[#allocation2 + $0x450] sm:$0xff]  ;;  %v452_v48 = vld [vmem:[#allocation2 + $0x488] sm:$0xff] }
  0x4e   : > { %983 = vmatpush1.bf16.msra.mxu1 %v982_v16  ;;  %v460_v49 = vld [vmem:[#allocation2 + $0x4c8] sm:$0xff]  ;;  %v454_v50 = vld [vmem:[#allocation2 + $0x498] sm:$0xff]  ;;  %v994_v52 = vpack.c.bf16 %v443_v43, %v435_v42  ;;  %v1058_v53 = vpack.c.bf16 %v445_v47, %v437_v46  ;;  %v451_v54 = vld [vmem:[#allocation2 + $0x480] sm:$0xff] }
  0x4f   : > { %985 = vmatprep.subr.bf16.mxu1 %v984_v20  ;;  %v462_v51 = vld [vmem:[#allocation2 + $0x4d8] sm:$0xff]  ;;  %v459_v55 = vld [vmem:[#allocation2 + $0x4c0] sm:$0xff]  ;;  %v996_v56 = vpack.c.bf16 %v460_v49, %v452_v48  ;;  %v453_v58 = vld [vmem:[#allocation2 + $0x490] sm:$0xff] }
  0x50   : > { %1043 = vmatpush1.bf16.msra.mxu0 %v1042_v5  ;;  %v1060_v57 = vpack.c.bf16 %v462_v51, %v454_v50  ;;  %v461_v59 = vld [vmem:[#allocation2 + $0x4d0] sm:$0xff]  ;;  %v468_v60 = vld [vmem:[#allocation2 + $0x508] sm:$0xff]  ;;  %v470_v62 = vld [vmem:[#allocation2 + $0x518] sm:$0xff]  ;;  %v998_v0 = vpack.c.bf16 %v459_v55, %v451_v54 }
  0x51   : > { %1045 = vmatprep.subr.bf16.mxu0 %v1044_v9  ;;  %v476_v61 = vld [vmem:[#allocation2 + $0x548] sm:$0xff]  ;;  %v478_v63 = vld [vmem:[#allocation2 + $0x558] sm:$0xff]  ;;  %v1062_v1 = vpack.c.bf16 %v461_v59, %v453_v58  ;;  %v467_v2 = vld [vmem:[#allocation2 + $0x500] sm:$0xff] }
  0x52   : > { %987 = vmatpush1.bf16.msra.mxu1 %v986_v28  ;;  %v475_v3 = vld [vmem:[#allocation2 + $0x540] sm:$0xff]  ;;  %v1000_v4 = vpack.c.bf16 %v476_v61, %v468_v60  ;;  %v1064_v5 = vpack.c.bf16 %v478_v63, %v470_v62  ;;  %v469_v6 = vld [vmem:[#allocation2 + $0x510] sm:$0xff]  ;;  %v484_v8 = vld [vmem:[#allocation2 + $0x588] sm:$0xff] }
  0x53   : > { %989 = vmatprep.subr.bf16.mxu1 %v988_v32  ;;  %v477_v7 = vld [vmem:[#allocation2 + $0x550] sm:$0xff]  ;;  %v492_v9 = vld [vmem:[#allocation2 + $0x5c8] sm:$0xff]  ;;  %v486_v10 = vld [vmem:[#allocation2 + $0x598] sm:$0xff]  ;;  %v1002_v12 = vpack.c.bf16 %v475_v3, %v467_v2 }
  0x54   : > { %1047 = vmatpush1.bf16.msra.mxu0 %v1046_v17  ;;  %v494_v11 = vld [vmem:[#allocation2 + $0x5d8] sm:$0xff]  ;;  %v1066_v13 = vpack.c.bf16 %v477_v7, %v469_v6  ;;  %v483_v14 = vld [vmem:[#allocation2 + $0x580] sm:$0xff]  ;;  %v1004_v16 = vpack.c.bf16 %v492_v9, %v484_v8  ;;  %v485_v18 = vld [vmem:[#allocation2 + $0x590] sm:$0xff] }
  0x55   : > { %1049 = vmatprep.subr.bf16.mxu0 %v1048_v21  ;;  %v491_v15 = vld [vmem:[#allocation2 + $0x5c0] sm:$0xff]  ;;  %v1068_v17 = vpack.c.bf16 %v494_v11, %v486_v10  ;;  %v493_v19 = vld [vmem:[#allocation2 + $0x5d0] sm:$0xff]  ;;  %v500_v20 = vld [vmem:[#allocation2 + $0x608] sm:$0xff] }
  0x56   : > { %991 = vmatpush1.bf16.msra.mxu1 %v990_v40  ;;  %v508_v21 = vld [vmem:[#allocation2 + $0x648] sm:$0xff]  ;;  %v502_v22 = vld [vmem:[#allocation2 + $0x618] sm:$0xff]  ;;  %v1006_v24 = vpack.c.bf16 %v491_v15, %v483_v14  ;;  %v1070_v25 = vpack.c.bf16 %v493_v19, %v485_v18  ;;  %v499_v26 = vld [vmem:[#allocation2 + $0x600] sm:$0xff] }
  0x57   : > { %993 = vmatprep.subr.bf16.mxu1 %v992_v44  ;;  %v510_v23 = vld [vmem:[#allocation2 + $0x658] sm:$0xff]  ;;  %v507_v27 = vld [vmem:[#allocation2 + $0x640] sm:$0xff]  ;;  %v1008_v28 = vpack.c.bf16 %v508_v21, %v500_v20  ;;  %v501_v30 = vld [vmem:[#allocation2 + $0x610] sm:$0xff] }
  0x58   : > { %1051 = vmatpush1.bf16.msra.mxu0 %v1050_v29  ;;  %v1072_v29 = vpack.c.bf16 %v510_v23, %v502_v22  ;;  %v509_v31 = vld [vmem:[#allocation2 + $0x650] sm:$0xff]  ;;  %v516_v32 = vld [vmem:[#allocation2 + $0x688] sm:$0xff]  ;;  %v518_v34 = vld [vmem:[#allocation2 + $0x698] sm:$0xff]  ;;  %v1010_v36 = vpack.c.bf16 %v507_v27, %v499_v26 }
  0x59   : > { %1053 = vmatprep.subr.bf16.mxu0 %v1052_v33  ;;  %v524_v33 = vld [vmem:[#allocation2 + $0x6c8] sm:$0xff]  ;;  %v526_v35 = vld [vmem:[#allocation2 + $0x6d8] sm:$0xff]  ;;  %v1074_v37 = vpack.c.bf16 %v509_v31, %v501_v30  ;;  %v515_v38 = vld [vmem:[#allocation2 + $0x680] sm:$0xff] }
  0x5a   : > { %995 = vmatpush1.bf16.msra.mxu1 %v994_v52  ;;  %v523_v39 = vld [vmem:[#allocation2 + $0x6c0] sm:$0xff]  ;;  %v1012_v40 = vpack.c.bf16 %v524_v33, %v516_v32  ;;  %v517_v42 = vld [vmem:[#allocation2 + $0x690] sm:$0xff]  ;;  %v532_v44 = vld [vmem:[#allocation2 + $0x708] sm:$0xff] }
  0x5b   : > { %997 = vmatprep.subr.bf16.mxu1 %v996_v56  ;;  %v525_v43 = vld [vmem:[#allocation2 + $0x6d0] sm:$0xff]  ;;  %v534_v46 = vld [vmem:[#allocation2 + $0x718] sm:$0xff]  ;;  %v1014_v48 = vpack.c.bf16 %v523_v39, %v515_v38  ;;  %v531_v52 = vld [vmem:[#allocation2 + $0x700] sm:$0xff] }
  0x5c   : > { %1055 = vmatpush1.bf16.msra.mxu0 %v1054_v41  ;;  %v1076_v41 = vpack.c.bf16 %v526_v35, %v518_v34  ;;  %v542_v47 = vld [vmem:[#allocation2 + $0x758] sm:$0xff]  ;;  %v1078_v49 = vpack.c.bf16 %v525_v43, %v517_v42  ;;  %v533_v55 = vld [vmem:[#allocation2 + $0x710] sm:$0xff]  ;;  %v548_v58 = vld [vmem:[#allocation2 + $0x788] sm:$0xff] }
  0x5d   : > { %1057 = vmatprep.subr.bf16.mxu0 %v1056_v45  ;;  %v540_v45 = vld [vmem:[#allocation2 + $0x748] sm:$0xff]  ;;  %v1080_v51 = vpack.c.bf16 %v542_v47, %v534_v46  ;;  %v541_v56 = vld [vmem:[#allocation2 + $0x750] sm:$0xff]  ;;  %v550_v60 = vld [vmem:[#allocation2 + $0x798] sm:$0xff] }
  0x5e   : > { %999 = vmatpush1.bf16.msra.mxu1 %v998_v0  ;;  %v1016_v50 = vpack.c.bf16 %v540_v45, %v532_v44  ;;  %v556_v59 = vld [vmem:[#allocation2 + $0x7c8] sm:$0xff]  ;;  %v558_v62 = vld [vmem:[#allocation2 + $0x7d8] sm:$0xff]  ;;  %v547_v63 = vld [vmem:[#allocation2 + $0x780] sm:$0xff] }
  0x5f   : > { %1001 = vmatprep.subr.bf16.mxu1 %v1000_v4  ;;  %v1020_v61 = vpack.c.bf16 %v556_v59, %v548_v58  ;;  %v555_v0 = vld [vmem:[#allocation2 + $0x7c0] sm:$0xff]  ;;  %v549_v3 = vld [vmem:[#allocation2 + $0x790] sm:$0xff]  ;;  %v312_v6 = vld [vmem:[#allocation2 + $0x28] sm:$0xff] }
  0x60   : > { %1059 = vmatpush1.bf16.msra.mxu0 %v1058_v53  ;;  %v539_v53 = vld [vmem:[#allocation2 + $0x740] sm:$0xff]  ;;  %v1022_v2 = vpack.c.bf16 %v555_v0, %v547_v63  ;;  %v557_v4 = vld [vmem:[#allocation2 + $0x7d0] sm:$0xff]  ;;  %v320_v7 = vld [vmem:[#allocation2 + $0x68] sm:$0xff] }
  0x61   : > { %1061 = vmatprep.subr.bf16.mxu0 %v1060_v57  ;;  %v1018_v54 = vpack.c.bf16 %v539_v53, %v531_v52  ;;  %v1082_v57 = vpack.c.bf16 %v541_v56, %v533_v55  ;;  %v314_v8 = vld [vmem:[#allocation2 + $0x38] sm:$0xff]  ;;  %v1088_v9 = vpack.c.bf16 %v320_v7, %v312_v6  ;;  %v319_v18 = vld [vmem:[#allocation2 + $0x60] sm:$0xff]  ;;  %v313_v19 = vld [vmem:[#allocation2 + $0x30] sm:$0xff] }
  0x62   : > { %1003 = vmatpush1.bf16.msra.mxu1 %v1002_v12  ;;  %v322_v10 = vld [vmem:[#allocation2 + $0x78] sm:$0xff]  ;;  %v321_v20 = vld [vmem:[#allocation2 + $0x70] sm:$0xff]  ;;  %v328_v22 = vld [vmem:[#allocation2 + $0xa8] sm:$0xff] }
  0x63   : > { %1005 = vmatprep.subr.bf16.mxu1 %v1004_v16  ;;  %v1152_v11 = vpack.c.bf16 %v322_v10, %v314_v8  ;;  %v311_v16 = vld [vmem:[#allocation2 + $0x20] sm:$0xff]  ;;  %v336_v23 = vld [vmem:[#allocation2 + $0xe8] sm:$0xff]  ;;  %v338_v26 = vld [vmem:[#allocation2 + $0xf8] sm:$0xff] }
  0x64   : > { %1063 = vmatpush1.bf16.msra.mxu0 %v1062_v1  ;;  %v1084_v1 = vpack.c.bf16 %v558_v62, %v550_v60  ;;  %v1090_v27 = vpack.c.bf16 %v319_v18, %v311_v16  ;;  %v335_v30 = vld [vmem:[#allocation2 + $0xe0] sm:$0xff]  ;;  %v329_v32 = vld [vmem:[#allocation2 + $0xb0] sm:$0xff]  ;;  %v344_v34 = vld [vmem:[#allocation2 + $0x128] sm:$0xff] }
  0x65   : > { %1065 = vmatprep.subr.bf16.mxu0 %v1064_v5  ;;  %v1086_v5 = vpack.c.bf16 %v557_v4, %v549_v3  ;;  %v337_v33 = vld [vmem:[#allocation2 + $0xf0] sm:$0xff]  ;;  %v352_v38 = vld [vmem:[#allocation2 + $0x168] sm:$0xff]  ;;  %v346_v39 = vld [vmem:[#allocation2 + $0x138] sm:$0xff] }
  0x66   : > { %1007 = vmatpush1.bf16.msra.mxu1 %v1006_v24  ;;  %v1158_v42 = vpack.c.bf16 %v337_v33, %v329_v32  ;;  %v343_v43 = vld [vmem:[#allocation2 + $0x120] sm:$0xff]  ;;  %v1096_v45 = vpack.c.bf16 %v352_v38, %v344_v34  ;;  %v345_v47 = vld [vmem:[#allocation2 + $0x130] sm:$0xff]  ;;  %v370_v52 = vld [vmem:[#allocation2 + $0x1f8] sm:$0xff] }
  0x67   : > { %1009 = vmatprep.subr.bf16.mxu1 %v1008_v28  ;;  %v1154_v28 = vpack.c.bf16 %v321_v20, %v313_v19  ;;  %v351_v44 = vld [vmem:[#allocation2 + $0x160] sm:$0xff]  ;;  %v361_v59 = vld [vmem:[#allocation2 + $0x1b0] sm:$0xff]  ;;  %v384_v62 = vld [vmem:[#allocation2 + $0x268] sm:$0xff] }
  0x68   : > { %1067 = vmatpush1.bf16.msra.mxu0 %v1066_v13  ;;  %v1098_v53 = vpack.c.bf16 %v351_v44, %v343_v43  ;;  %v359_v55 = vld [vmem:[#allocation2 + $0x1a0] sm:$0xff]  ;;  %v369_v60 = vld [vmem:[#allocation2 + $0x1f0] sm:$0xff]  ;;  %v378_v63 = vld [vmem:[#allocation2 + $0x238] sm:$0xff] }
  0x69   : > { %1069 = vmatprep.subr.bf16.mxu0 %v1068_v17  ;;  %v367_v56 = vld [vmem:[#allocation2 + $0x1e0] sm:$0xff]  ;;  %v386_v0 = vld [vmem:[#allocation2 + $0x278] sm:$0xff]  ;;  %v377_v7 = vld [vmem:[#allocation2 + $0x230] sm:$0xff] }
  0x6a   : > { %1011 = vmatpush1.bf16.msra.mxu1 %v1010_v36  ;;  %v1092_v36 = vpack.c.bf16 %v336_v23, %v328_v22  ;;  %v375_v3 = vld [vmem:[#allocation2 + $0x220] sm:$0xff]  ;;  %v1168_v6 = vpack.c.bf16 %v386_v0, %v378_v63  ;;  %v385_v8 = vld [vmem:[#allocation2 + $0x270] sm:$0xff]  ;;  %v400_v10 = vld [vmem:[#allocation2 + $0x2e8] sm:$0xff] }
  0x6b   : > { %1013 = vmatprep.subr.bf16.mxu1 %v1012_v40  ;;  %v354_v40 = vld [vmem:[#allocation2 + $0x178] sm:$0xff]  ;;  %v383_v4 = vld [vmem:[#allocation2 + $0x260] sm:$0xff]  ;;  %v393_v19 = vld [vmem:[#allocation2 + $0x2b0] sm:$0xff] }
  0x6c   : > { %1071 = vmatpush1.bf16.msra.mxu0 %v1070_v25  ;;  %v330_v25 = vld [vmem:[#allocation2 + $0xb8] sm:$0xff]  ;;  %v1160_v46 = vpack.c.bf16 %v354_v40, %v346_v39  ;;  %v399_v16 = vld [vmem:[#allocation2 + $0x2e0] sm:$0xff]  ;;  %v401_v20 = vld [vmem:[#allocation2 + $0x2f0] sm:$0xff] }
  0x6d   : > { %1073 = vmatprep.subr.bf16.mxu0 %v1072_v29  ;;  %v327_v29 = vld [vmem:[#allocation2 + $0xa0] sm:$0xff]  ;;  %v416_v22 = vld [vmem:[#allocation2 + $0x368] sm:$0xff]  ;;  %v410_v23 = vld [vmem:[#allocation2 + $0x338] sm:$0xff] }
  0x6e   : > { %1015 = vmatpush1.bf16.msra.mxu1 %v1014_v48  ;;  %v353_v48 = vld [vmem:[#allocation2 + $0x170] sm:$0xff]  ;;  %v424_v33 = vld [vmem:[#allocation2 + $0x3a8] sm:$0xff]  ;;  %v423_v40 = vld [vmem:[#allocation2 + $0x3a0] sm:$0xff] }
  0x6f   : > { %1017 = vmatprep.subr.bf16.mxu1 %v1016_v50  ;;  %v368_v50 = vld [vmem:[#allocation2 + $0x1e8] sm:$0xff]  ;;  %v417_v32 = vld [vmem:[#allocation2 + $0x370] sm:$0xff]  ;;  %v455_v0 = vld [vmem:[#allocation2 + $0x4a0] sm:$0xff] }
  0x70   : > { %1075 = vmatpush1.bf16.msra.mxu0 %v1074_v37  ;;  %v1156_v37 = vpack.c.bf16 %v338_v26, %v330_v25  ;;  %v1174_v26 = vpack.c.bf16 %v401_v20, %v393_v19  ;;  %v432_v34 = vld [vmem:[#allocation2 + $0x3e8] sm:$0xff]  ;;  %v425_v44 = vld [vmem:[#allocation2 + $0x3b0] sm:$0xff]  ;;  %v490_v20 = vld [vmem:[#allocation2 + $0x5b8] sm:$0xff] }
  0x71   : > { %1077 = vmatprep.subr.bf16.mxu0 %v1076_v41  ;;  %v1094_v41 = vpack.c.bf16 %v335_v30, %v327_v29  ;;  %v496_v19 = vld [vmem:[#allocation2 + $0x5e8] sm:$0xff] }
  0x72   : > { %1019 = vmatpush1.bf16.msra.mxu1 %v1018_v54  ;;  %v1162_v54 = vpack.c.bf16 %v353_v48, %v345_v47  ;;  %v448_v47 = vld [vmem:[#allocation2 + $0x468] sm:$0xff]  ;;  %v442_v48 = vld [vmem:[#allocation2 + $0x438] sm:$0xff] }
  0x73   : > { %1021 = vmatprep.subr.bf16.mxu1 %v1020_v61  ;;  %v376_v61 = vld [vmem:[#allocation2 + $0x228] sm:$0xff] }
  0x74   : > { %1079 = vmatpush1.bf16.msra.mxu0 %v1078_v49  ;;  %v360_v49 = vld [vmem:[#allocation2 + $0x1a8] sm:$0xff] }
  0x75   : > { %1081 = vmatprep.subr.bf16.mxu0 %v1080_v51  ;;  %v362_v51 = vld [vmem:[#allocation2 + $0x1b8] sm:$0xff] }
  0x76   : > { %1023 = vmatpush1.bf16.msra.mxu1 %v1022_v2  ;;  %v1164_v58 = vpack.c.bf16 %v370_v52, %v362_v51  ;;  %v1166_v2 = vpack.c.bf16 %v369_v60, %v361_v59  ;;  %v439_v52 = vld [vmem:[#allocation2 + $0x420] sm:$0xff]  ;;  %v464_v59 = vld [vmem:[#allocation2 + $0x4e8] sm:$0xff]  ;;  %v458_v60 = vld [vmem:[#allocation2 + $0x4b8] sm:$0xff] }
  0x77   : > { %1089 = vmatprep.subr.bf16.mxu1 %v1088_v9  ;;  %v392_v9 = vld [vmem:[#allocation2 + $0x2a8] sm:$0xff] }
  0x78   : > { %1083 = vmatpush1.bf16.msra.mxu0 %v1082_v57  ;;  %v1100_v57 = vpack.c.bf16 %v368_v50, %v360_v49  ;;  %v450_v49 = vld [vmem:[#allocation2 + $0x478] sm:$0xff] }
  0x79   : > { %1085 = vmatprep.subr.bf16.mxu0 %v1084_v1  ;;  %v1102_v1 = vpack.c.bf16 %v367_v56, %v359_v55  ;;  %v1184_v55 = vpack.c.bf16 %v450_v49, %v442_v48  ;;  %v441_v56 = vld [vmem:[#allocation2 + $0x430] sm:$0xff]  ;;  %v519_v49 = vld [vmem:[#allocation2 + $0x6a0] sm:$0xff] }
  0x7c   : > { %1087 = vmatpush1.bf16.msra.mxu0 %v1086_v5  ;;  %v1104_v5 = vpack.c.bf16 %v384_v62, %v376_v61  ;;  %v466_v61 = vld [vmem:[#allocation2 + $0x4f8] sm:$0xff] }
  0x7d   : > { %1153 = vmatprep.subr.bf16.mxu0 %v1152_v11  ;;  %v394_v11 = vld [vmem:[#allocation2 + $0x2b8] sm:$0xff] }
  0xb5   : > { %v217_v12 = vpop.permute.xlu0 %216 }
 0x112   : > { %v296_v13 = vpop.f32.mrb[0].mxu0 }
 0x113   : > { %v297_v14 = vadd.f32 %v296_v13, %v217_v12  ;;  %v298_v15 = vpop.f32.mrb[1].mxu0  ;;  %v1106_v13 = vpack.c.bf16 %v383_v4, %v375_v3  ;;  %v1188_v3 = vpack.c.bf16 %v466_v61, %v458_v60  ;;  %v457_v4 = vld [vmem:[#allocation2 + $0x4b0] sm:$0xff]  ;;  %v535_v61 = vld [vmem:[#allocation2 + $0x720] sm:$0xff] }
 0x114   : > { %v299_v17 = vadd.f32 %v298_v15, %v217_v12  ;;  %v402_v12 = vld [vmem:[#allocation2 + $0x2f8] sm:$0xff]  ;;  %v391_v15 = vld [vmem:[#allocation2 + $0x2a0] sm:$0xff] }
 0x115   : > { %v303_v21 = vmul.f32 0.1, %v297_v14  ;;  %vm301_vm2 = vcmp.ge.f32.partialorder %v297_v14, 0.0  ;;  %v1172_v18 = vpack.c.bf16 %v402_v12, %v394_v11  ;;  %v1110_v25 = vpack.c.bf16 %v399_v16, %v391_v15  ;;  %v471_v12 = vld [vmem:[#allocation2 + $0x520] sm:$0xff]  ;;  %v473_v16 = vld [vmem:[#allocation2 + $0x530] sm:$0xff] }
 0x116   : > { %vm302_vm3 = vcmp.ge.f32.partialorder %v299_v17, 0.0  ;;  %v304_v24 = vmul.f32 0.1, %v299_v17 }
 0x117   : > { %v1496_v35 = vsel %vm301_vm2, %v297_v14, %v303_v21  ;;  %v1170_v14 = vpack.c.bf16 %v385_v8, %v377_v7  ;;  %v408_v21 = vld [vmem:[#allocation2 + $0x328] sm:$0xff]  ;;  %v474_v8 = vld [vmem:[#allocation2 + $0x538] sm:$0xff] }
 0x118   : > { %v306_v31 = vsel %vm302_vm3, %v299_v17, %v304_v24  ;;  %v1108_v17 = vpack.c.bf16 %v400_v10, %v392_v9  ;;  %v418_v24 = vld [vmem:[#allocation2 + $0x378] sm:$0xff]  ;;  %v1112_v29 = vpack.c.bf16 %v416_v22, %v408_v21  ;;  %v480_v7 = vld [vmem:[#allocation2 + $0x568] sm:$0xff] }
 0x119   : > { %627 = vmatprep.mubr.f32.mxu1 %v306_v31  ;;  %698 = vmatprep.mubr.f32.mxu0 %v306_v31  ;;  %v1176_v30 = vpack.c.bf16 %v418_v24, %v410_v23  ;;  %v482_v9 = vld [vmem:[#allocation2 + $0x578] sm:$0xff]  ;;  %v487_v24 = vld [vmem:[#allocation2 + $0x5a0] sm:$0xff] }
 0x11a   : > { %628 = vmatmul.mubr.f32.vlgmr.msra.gmra.mrb[0].mxu1 %v1496_v35  ;;  %699 = vmatmul.mubr.f32.vlgmr.msra.gmra.mrb[2].mxu0 %v1496_v35  ;;  %v1192_v15 = vpack.c.bf16 %v482_v9, %v474_v8  ;;  %v498_v21 = vld [vmem:[#allocation2 + $0x5f8] sm:$0xff]  ;;  %v551_v9 = vld [vmem:[#allocation2 + $0x7a0] sm:$0xff] }
 0x11b   : > { %1091 = vmatpush1.bf16.msra.mxu1 %v1090_v27  ;;  %1155 = vmatpush1.bf16.msra.mxu0 %v1154_v28  ;;  %v407_v27 = vld [vmem:[#allocation2 + $0x320] sm:$0xff] }
 0x11c   : > { %769 = vmatprep.mubr.f32.mxu1 %v306_v31  ;;  %840 = vmatprep.mubr.f32.mxu0 %v306_v31  ;;  %v415_v28 = vld [vmem:[#allocation2 + $0x360] sm:$0xff]  ;;  %v409_v31 = vld [vmem:[#allocation2 + $0x330] sm:$0xff] }
 0x11d   : > { %1093 = vmatprep.subr.bf16.mxu1 %v1092_v36  ;;  %1157 = vmatprep.subr.bf16.mxu0 %v1156_v37  ;;  %v426_v36 = vld [vmem:[#allocation2 + $0x3b8] sm:$0xff]  ;;  %v1114_v38 = vpack.c.bf16 %v415_v28, %v407_v27  ;;  %v1178_v39 = vpack.c.bf16 %v417_v32, %v409_v31  ;;  %v1196_v27 = vpack.c.bf16 %v498_v21, %v490_v20  ;;  %v489_v28 = vld [vmem:[#allocation2 + $0x5b0] sm:$0xff]  ;;  %v512_v31 = vld [vmem:[#allocation2 + $0x668] sm:$0xff] }
 0x11e   : > { %v434_v37 = vld [vmem:[#allocation2 + $0x3f8] sm:$0xff] }
 0x11f   : > { %1095 = vmatpush1.bf16.msra.mxu1 %v1094_v41  ;;  %1159 = vmatpush1.bf16.msra.mxu0 %v1158_v42  ;;  %v431_v41 = vld [vmem:[#allocation2 + $0x3e0] sm:$0xff]  ;;  %v1116_v42 = vpack.c.bf16 %v432_v34, %v424_v33  ;;  %v1180_v43 = vpack.c.bf16 %v434_v37, %v426_v36  ;;  %v506_v32 = vld [vmem:[#allocation2 + $0x638] sm:$0xff] }
 0x120   : > { %1097 = vmatprep.subr.bf16.mxu1 %v1096_v45  ;;  %1161 = vmatprep.subr.bf16.mxu0 %v1160_v46  ;;  %v433_v45 = vld [vmem:[#allocation2 + $0x3f0] sm:$0xff]  ;;  %v440_v46 = vld [vmem:[#allocation2 + $0x428] sm:$0xff]  ;;  %v1118_v50 = vpack.c.bf16 %v431_v41, %v423_v40  ;;  %v514_v33 = vld [vmem:[#allocation2 + $0x678] sm:$0xff] }
 0x121   : > { %v1182_v51 = vpack.c.bf16 %v433_v45, %v425_v44  ;;  %v503_v37 = vld [vmem:[#allocation2 + $0x620] sm:$0xff]  ;;  %v1200_v40 = vpack.c.bf16 %v514_v33, %v506_v32  ;;  %v505_v41 = vld [vmem:[#allocation2 + $0x630] sm:$0xff]  ;;  %v528_v44 = vld [vmem:[#allocation2 + $0x6e8] sm:$0xff] }
 0x122   : > { %v522_v45 = vld [vmem:[#allocation2 + $0x6b8] sm:$0xff] }
 0x123   : > { %1099 = vmatpush1.bf16.msra.mxu1 %v1098_v53  ;;  %1163 = vmatpush1.bf16.msra.mxu0 %v1162_v54  ;;  %v447_v53 = vld [vmem:[#allocation2 + $0x460] sm:$0xff]  ;;  %v1120_v54 = vpack.c.bf16 %v448_v47, %v440_v46  ;;  %v530_v46 = vld [vmem:[#allocation2 + $0x6f8] sm:$0xff] }
 0x124   : > { %1101 = vmatprep.subr.bf16.mxu1 %v1100_v57  ;;  %1165 = vmatprep.subr.bf16.mxu0 %v1164_v58  ;;  %v449_v57 = vld [vmem:[#allocation2 + $0x470] sm:$0xff]  ;;  %v456_v58 = vld [vmem:[#allocation2 + $0x4a8] sm:$0xff]  ;;  %v1122_v62 = vpack.c.bf16 %v447_v53, %v439_v52  ;;  %v1204_v52 = vpack.c.bf16 %v530_v46, %v522_v45 }
 0x125   : > { %v1186_v63 = vpack.c.bf16 %v449_v57, %v441_v56  ;;  %v521_v53 = vld [vmem:[#allocation2 + $0x6b0] sm:$0xff]  ;;  %v544_v56 = vld [vmem:[#allocation2 + $0x768] sm:$0xff]  ;;  %v538_v57 = vld [vmem:[#allocation2 + $0x738] sm:$0xff] }
 0x127   : > { %1103 = vmatpush1.bf16.msra.mxu1 %v1102_v1  ;;  %1167 = vmatpush1.bf16.msra.mxu0 %v1166_v2  ;;  %v463_v1 = vld [vmem:[#allocation2 + $0x4e0] sm:$0xff]  ;;  %v1124_v2 = vpack.c.bf16 %v464_v59, %v456_v58  ;;  %v546_v58 = vld [vmem:[#allocation2 + $0x778] sm:$0xff] }
 0x128   : > { %1105 = vmatprep.subr.bf16.mxu1 %v1104_v5  ;;  %1169 = vmatprep.subr.bf16.mxu0 %v1168_v6  ;;  %v465_v5 = vld [vmem:[#allocation2 + $0x4f0] sm:$0xff]  ;;  %v472_v6 = vld [vmem:[#allocation2 + $0x528] sm:$0xff]  ;;  %v1126_v10 = vpack.c.bf16 %v463_v1, %v455_v0  ;;  %v1208_v0 = vpack.c.bf16 %v546_v58, %v538_v57 }
 0x129   : > { %v1190_v11 = vpack.c.bf16 %v465_v5, %v457_v4  ;;  %v537_v1 = vld [vmem:[#allocation2 + $0x730] sm:$0xff]  ;;  %v560_v4 = vld [vmem:[#allocation2 + $0x7e8] sm:$0xff]  ;;  %v554_v5 = vld [vmem:[#allocation2 + $0x7b8] sm:$0xff] }
 0x12b   : > { %1107 = vmatpush1.bf16.msra.mxu1 %v1106_v13  ;;  %1171 = vmatpush1.bf16.msra.mxu0 %v1170_v14  ;;  %v479_v13 = vld [vmem:[#allocation2 + $0x560] sm:$0xff]  ;;  %v1128_v14 = vpack.c.bf16 %v480_v7, %v472_v6  ;;  %v562_v6 = vld [vmem:[#allocation2 + $0x7f8] sm:$0xff] }
 0x12c   : > { %1109 = vmatprep.subr.bf16.mxu1 %v1108_v17  ;;  %1173 = vmatprep.subr.bf16.mxu0 %v1172_v18  ;;  %v481_v17 = vld [vmem:[#allocation2 + $0x570] sm:$0xff]  ;;  %v488_v18 = vld [vmem:[#allocation2 + $0x5a8] sm:$0xff]  ;;  %v1130_v22 = vpack.c.bf16 %v479_v13, %v471_v12  ;;  %v559_v12 = vld [vmem:[#allocation2 + $0x7e0] sm:$0xff] }
 0x12d   : > { %v1194_v23 = vpack.c.bf16 %v481_v17, %v473_v16  ;;  %v553_v13 = vld [vmem:[#allocation2 + $0x7b0] sm:$0xff] }
 0x12f   : > { %1111 = vmatpush1.bf16.msra.mxu1 %v1110_v25  ;;  %1175 = vmatpush1.bf16.msra.mxu0 %v1174_v26  ;;  %v495_v25 = vld [vmem:[#allocation2 + $0x5e0] sm:$0xff]  ;;  %v1132_v26 = vpack.c.bf16 %v496_v19, %v488_v18 }
 0x130   : > { %1113 = vmatprep.subr.bf16.mxu1 %v1112_v29  ;;  %1177 = vmatprep.subr.bf16.mxu0 %v1176_v30  ;;  %v497_v29 = vld [vmem:[#allocation2 + $0x5f0] sm:$0xff]  ;;  %v504_v30 = vld [vmem:[#allocation2 + $0x628] sm:$0xff]  ;;  %v1134_v34 = vpack.c.bf16 %v495_v25, %v487_v24 }
 0x131   : > { %v1198_v36 = vpack.c.bf16 %v497_v29, %v489_v28 }
 0x133   : > { %1115 = vmatpush1.bf16.msra.mxu1 %v1114_v38  ;;  %1179 = vmatpush1.bf16.msra.mxu0 %v1178_v39  ;;  %v511_v38 = vld [vmem:[#allocation2 + $0x660] sm:$0xff]  ;;  %v1136_v39 = vpack.c.bf16 %v512_v31, %v504_v30 }
 0x134   : > { %1117 = vmatprep.subr.bf16.mxu1 %v1116_v42  ;;  %1181 = vmatprep.subr.bf16.mxu0 %v1180_v43  ;;  %v513_v42 = vld [vmem:[#allocation2 + $0x670] sm:$0xff]  ;;  %v520_v43 = vld [vmem:[#allocation2 + $0x6a8] sm:$0xff]  ;;  %v1138_v47 = vpack.c.bf16 %v511_v38, %v503_v37 }
 0x135   : > { %v1202_v48 = vpack.c.bf16 %v513_v42, %v505_v41 }
 0x137   : > { %1119 = vmatpush1.bf16.msra.mxu1 %v1118_v50  ;;  %1183 = vmatpush1.bf16.msra.mxu0 %v1182_v51  ;;  %v527_v50 = vld [vmem:[#allocation2 + $0x6e0] sm:$0xff]  ;;  %v1140_v51 = vpack.c.bf16 %v528_v44, %v520_v43 }
 0x138   : > { %1121 = vmatprep.subr.bf16.mxu1 %v1120_v54  ;;  %1185 = vmatprep.subr.bf16.mxu0 %v1184_v55  ;;  %v529_v54 = vld [vmem:[#allocation2 + $0x6f0] sm:$0xff]  ;;  %v536_v55 = vld [vmem:[#allocation2 + $0x728] sm:$0xff]  ;;  %v1142_v59 = vpack.c.bf16 %v527_v50, %v519_v49 }
 0x139   : > { %v1206_v60 = vpack.c.bf16 %v529_v54, %v521_v53 }
 0x13b   : > { %1123 = vmatpush1.bf16.msra.mxu1 %v1122_v62  ;;  %1187 = vmatpush1.bf16.msra.mxu0 %v1186_v63  ;;  %v543_v62 = vld [vmem:[#allocation2 + $0x760] sm:$0xff]  ;;  %v1144_v63 = vpack.c.bf16 %v544_v56, %v536_v55 }
 0x13c   : > { %1125 = vmatprep.subr.bf16.mxu1 %v1124_v2  ;;  %1189 = vmatprep.subr.bf16.mxu0 %v1188_v3  ;;  %v545_v2 = vld [vmem:[#allocation2 + $0x770] sm:$0xff]  ;;  %v552_v3 = vld [vmem:[#allocation2 + $0x7a8] sm:$0xff]  ;;  %v1146_v7 = vpack.c.bf16 %v543_v62, %v535_v61 }
 0x13d   : > { %v1210_v8 = vpack.c.bf16 %v545_v2, %v537_v1 }
 0x13f   : > { %1127 = vmatpush1.bf16.msra.mxu1 %v1126_v10  ;;  %1191 = vmatpush1.bf16.msra.mxu0 %v1190_v11  ;;  %v1148_v10 = vpack.c.bf16 %v560_v4, %v552_v3  ;;  %v1212_v11 = vpack.c.bf16 %v562_v6, %v554_v5 }
 0x140   : > { %1129 = vmatprep.subr.bf16.mxu1 %v1128_v14  ;;  %1193 = vmatprep.subr.bf16.mxu0 %v1192_v15  ;;  %v561_v14 = vld [vmem:[#allocation2 + $0x7f0] sm:$0xff]  ;;  %v1150_v15 = vpack.c.bf16 %v559_v12, %v551_v9 }
 0x141   : > { %v1214_v16 = vpack.c.bf16 %v561_v14, %v553_v13 }
 0x143   : > { %1131 = vmatpush1.bf16.msra.mxu1 %v1130_v22  ;;  %1195 = vmatpush1.bf16.msra.mxu0 %v1194_v23 }
 0x144   : > { %1133 = vmatprep.subr.bf16.mxu1 %v1132_v26  ;;  %1197 = vmatprep.subr.bf16.mxu0 %v1196_v27 }
 0x147   : > { %1135 = vmatpush1.bf16.msra.mxu1 %v1134_v34  ;;  %1199 = vmatpush1.bf16.msra.mxu0 %v1198_v36 }
 0x148   : > { %1137 = vmatprep.subr.bf16.mxu1 %v1136_v39  ;;  %1201 = vmatprep.subr.bf16.mxu0 %v1200_v40 }
 0x14b   : > { %1139 = vmatpush1.bf16.msra.mxu1 %v1138_v47  ;;  %1203 = vmatpush1.bf16.msra.mxu0 %v1202_v48 }
 0x14c   : > { %1141 = vmatprep.subr.bf16.mxu1 %v1140_v51  ;;  %1205 = vmatprep.subr.bf16.mxu0 %v1204_v52 }
 0x14f   : > { %1143 = vmatpush1.bf16.msra.mxu1 %v1142_v59  ;;  %1207 = vmatpush1.bf16.msra.mxu0 %v1206_v60 }
 0x150   : > { %1145 = vmatprep.subr.bf16.mxu1 %v1144_v63  ;;  %1209 = vmatprep.subr.bf16.mxu0 %v1208_v0 }
 0x153   : > { %1147 = vmatpush1.bf16.msra.mxu1 %v1146_v7  ;;  %1211 = vmatpush1.bf16.msra.mxu0 %v1210_v8 }
 0x154   : > { %1149 = vmatprep.subr.bf16.mxu1 %v1148_v10  ;;  %1213 = vmatprep.subr.bf16.mxu0 %v1212_v11 }
 0x157   : > { %1151 = vmatpush1.bf16.msra.mxu1 %v1150_v15  ;;  %1215 = vmatpush1.bf16.msra.mxu0 %v1214_v16 }
 0x15a   : > { %770 = vmatmul.mubr.f32.vlgmr.msra.gmra.mrb[2].mxu1 %v1496_v35  ;;  %841 = vmatmul.mubr.f32.vlgmr.msra.gmra.mrb[4].mxu0 %v1496_v35 }
 0x1ed   : > { %v629_v17 = vpop.f32.mrb[0].mxu1  ;;  %v700_v18 = vpop.f32.mrb[2].mxu0 }
 0x1ee   : > { %847 = vst [vmem:[%s205_s11] sm:$0xff] %v629_v17  ;;  %849 = vst [vmem:[%s205_s11 + $0x10] sm:$0xff] %v700_v18  ;;  %v631_v19 = vpop.f32.mrb[1].mxu1  ;;  %v702_v20 = vpop.f32.mrb[3].mxu0 }
 0x1ef   : > { %848 = vst [vmem:[%s205_s11 + $0x8] sm:$0xff] %v631_v19  ;;  %850 = vst [vmem:[%s205_s11 + $0x18] sm:$0xff] %v702_v20 }
 0x22d   : > { %v771_v21 = vpop.f32.mrb[2].mxu1  ;;  %v842_v22 = vpop.f32.mrb[4].mxu0 }
 0x22e   : > { %851 = vst [vmem:[%s205_s11 + $0x20] sm:$0xff] %v771_v21  ;;  %853 = vst [vmem:[%s205_s11 + $0x30] sm:$0xff] %v842_v22  ;;  %v773_v35 = vpop.f32.mrb[3].mxu1  ;;  %v844_v23 = vpop.f32.mrb[5].mxu0 }
 0x22f   : > { %852 = vst [vmem:[%s205_s11 + $0x28] sm:$0xff] %v773_v35  ;;  %854 = vst [vmem:[%s205_s11 + $0x38] sm:$0xff] %v844_v23 }
 0x230   : > { %1313 = shalt.err (!%p1310_p7)
}
 0x231   : > { %s1314_s27 = scalar_lea.hbm %s1507_s22, 1024  ;;  %s1318_s7 = scalar_lea.hbm %s1553_s4, 2048 }
 0x232   : > { %p1315_p8 = scmp.ne.s32.totalorder %s1507_s22, %s1314_s27  ;;  %p1319_p1 = scmp.lt.u32.totalorder %s1507_s22, %s1553_s4 }
 0x233   : > { %p1320_p0 = scmp.lt.u32.totalorder %s1318_s7, %s1314_s27  ;;  %p1322_p6 = scmp.lt.u32.totalorder %s1314_s27, %s1507_s22 }
 0x234   : > { %p1316_p11 = pnand %p1315_p8, %p1564_p9 }
 0x235   : > { %p1321_p5 = por %p1320_p0, %p1319_p1 }
 0x236   : > { %p1317_p13 = pneg %p1316_p11 }
 0x237   : > { %p1323_p10 = por %p1322_p6, %p1321_p5 }
 0x239   : > { %p1324_p12 = pnand %p1323_p10, %p1317_p13 }
 0x23b   : > { %1327 = shalt.err (!%p1324_p12)
}
 0x23c   : > { %1220 = dma.vmem_to_hbm [thread:$0]  (%p1564_p9), %s1509_s13, 1024, %s1507_s22, %s856_s19  }
 0x23d PF: > { %p1232_p2 = scmp.ge.s32.totalorder %s1366_s18, 2  ;;  %s882_s10 = sand.u32 1, %s1354_s15  }
 0x23e   : > { %p1565_p3 = scmp.ne.s32.totalorder %s1558_s26, 0  ;;  %s883_s11 = scalar_lea.sflag [#allocation4], %s882_s10 }
 0x240   : > { %p1227_p4 = pnand %p1232_p2, %p1565_p3 }
 0x242   : > { %1349 = dma.done.wait (!%p1227_p4), %s883_s11, 1024  }
 0x243   : > { %1351 = vsyncadd (!%p1227_p4), %s883_s11, 4294966272  ;;  %p15_p7 = scmp.ge.s32.totalorder %s1424_s21, 4   ;;  %s1566_s15 = smov %s1358_s16 }
 0x244   : > { %s1567_s16 = smov %s1362_s17  ;;  %s1568_s17 = smov %s1435_s24 }
 0x245   : > { %s1569_s18 = smov %s1424_s21  ;;  %17 = sbr.rel (!%p15_p7) target bundleno = 4 (0x4), region = 76 }
 0x24c   :  { %888 = vsyncpa [#allocation3], 1 }
 0x24d   :  { %890 = vsyncpa [#allocation3 + $0x1], 1 }
 0x24e   :  { %891 = vsyncpa [#allocation4], 1 }
 0x24f   :  { %893 = vsyncpa [#allocation4 + $0x1], 1 }

</bundles_post_ra>
